<compile_context>
chip_gen: v7x
topology: tpu7x:2x2x1
jax: 0.10.0
libtpu: 0.0.40
codegen_flags: <defaults>
</compile_context>

<pallas_src>
import functools

import jax
import jax.numpy as jnp
from jax.experimental import pallas as pl
from jax.experimental.pallas import tpu as pltpu

_LANES = 128


def _round_up(x, m):
    return (x + m - 1) // m * m


def _fold_partial(sq, out_lanes):
    """Reduce a (tile_b, D) f32 tile to an (8, out_lanes) partial sum."""
    tb, d = sq.shape
    if out_lanes == _LANES:
        # Statically unrolled vreg-column adds across the lane-tile groups.
        acc = sq[:, :_LANES]
        for c in range(1, d // _LANES):
            acc = acc + sq[:, c * _LANES:(c + 1) * _LANES]
    else:
        # D not 128-aligned: cross-lane reduce (XLU has plenty of slack).
        acc = jnp.sum(sq, axis=1, keepdims=True)          # (tb, 1)
    # Sublane fold: pure VPU adds of whole vregs.
    return jnp.sum(acc.reshape(tb // 8, 8, out_lanes), axis=0)  # (8, out_lanes)


def _fused_center_loss_kernel(feat_ref, lbl_ref, cent_ref, out_ref, *, out_lanes):
    # feat_ref: (tile_b, D) feature tile
    # lbl_ref : (tile_b, 1) int32 labels (-1 on padded rows)
    # cent_ref: (C, D) full centers table, VMEM-resident (constant index map)
    # out_ref : (8, out_lanes) f32 partial for this tile
    feat = feat_ref[...].astype(jnp.float32)
    cent = cent_ref[...].astype(jnp.float32)
    lbl = lbl_ref[...]                                       # (tile_b, 1) int32
    n_cls = cent.shape[0]
    cls = jax.lax.broadcasted_iota(jnp.int32, (feat.shape[0], n_cls), 1)
    onehot = jnp.where(lbl == cls, 1.0, 0.0).astype(jnp.float32)   # (tile_b, C)
    # In-kernel gather: exact (0/1 weights, one term per row), runs on the MXU.
    gathered = jnp.dot(onehot, cent, preferred_element_type=jnp.float32)
    diff = feat - gathered
    out_ref[...] = _fold_partial(diff * diff, out_lanes)


def _streaming_center_loss_kernel(feat_ref, cent_ref, out_ref, *, out_lanes):
    # Fallback: centers_batch pre-gathered in the wrapper (large C*D).
    diff = feat_ref[...].astype(jnp.float32) - cent_ref[...].astype(jnp.float32)
    out_ref[...] = _fold_partial(diff * diff, out_lanes)


@functools.partial(
    jax.jit, static_argnames=("target_block_bytes", "fuse_gather_limit_bytes"))
def center_loss(feature, label, centers, batch_size, *,
                target_block_bytes=2 * 1024 * 1024,
                fuse_gather_limit_bytes=4 * 1024 * 1024):
    """feature: (B, D), label: (B,) int, centers: (C, D), batch_size: scalar."""
    B, D = feature.shape
    C = centers.shape[0]
    label = label.astype(jnp.int32)

    feat_item = jnp.dtype(feature.dtype).itemsize
    cent_item = jnp.dtype(centers.dtype).itemsize
    # Packed sublane tile: 8 for 32-bit, 16 for 16-bit, 32 for 8-bit inputs.
    sub = {4: 8, 2: 16, 1: 32}.get(feat_item, 8)

    # ---- pick the B-tile -----------------------------------------------------
    rows_budget = max(sub, (target_block_bytes // max(1, D * feat_item)) // sub * sub)
    b_rounded = _round_up(B, sub)
    if b_rounded <= rows_budget:
        if b_rounded >= 32 * sub:
            # Enough work to split across both v7x TensorCores.
            tile_b = _round_up(pl.cdiv(b_rounded, 2), sub)
        else:
            tile_b = b_rounded
    else:
        tile_b = rows_budget
        t = rows_budget
        while t >= max(sub, rows_budget // 2):   # prefer a tile that divides B (no pad)
            if b_rounded % t == 0:
                tile_b = t
                break
            t -= sub
    num_tiles = pl.cdiv(b_rounded, tile_b)
    b_pad = num_tiles * tile_b

    out_lanes = _LANES if D % _LANES == 0 else 1
    out_shape = jax.ShapeDtypeStruct((num_tiles * 8, out_lanes), jnp.float32)
    out_spec = pl.BlockSpec((8, out_lanes), lambda i: (i, 0))
    feat_spec = pl.BlockSpec((tile_b, D), lambda i: (i, 0))
    compiler_params = pltpu.CompilerParams(
        dimension_semantics=("parallel",),
        vmem_limit_bytes=48 * 1024 * 1024,
    )

    fuse = C * D * cent_item <= fuse_gather_limit_bytes

    if fuse:
        feat_p = feature
        lbl_p = label.reshape(B, 1)
        if b_pad != B:
            # Padded feature rows are 0 and padded labels are -1 -> one-hot row
            # is all zeros -> gathered row is 0 -> zero contribution to the sum.
            feat_p = jnp.pad(feature, ((0, b_pad - B), (0, 0)))
            lbl_p = jnp.pad(lbl_p, ((0, b_pad - B), (0, 0)), constant_values=-1)
        partial = pl.pallas_call(
            functools.partial(_fused_center_loss_kernel, out_lanes=out_lanes),
            out_shape=out_shape,
            grid_spec=pl.GridSpec(
                grid=(num_tiles,),
                in_specs=[
                    feat_spec,
                    pl.BlockSpec((tile_b, 1), lambda i: (i, 0)),
                    pl.BlockSpec((C, D), lambda i: (0, 0)),   # resident in VMEM
                ],
                out_specs=out_spec,
            ),
            compiler_params=compiler_params,
        )(feat_p, lbl_p, centers)
    else:
        # Large centers table: hoisted XLA gather, then plain streaming kernel.
        centers_batch = jnp.take(centers, label, axis=0)
        feat_p = feature
        if b_pad != B:
            feat_p = jnp.pad(feature, ((0, b_pad - B), (0, 0)))
            centers_batch = jnp.pad(centers_batch, ((0, b_pad - B), (0, 0)))
        partial = pl.pallas_call(
            functools.partial(_streaming_center_loss_kernel, out_lanes=out_lanes),
            out_shape=out_shape,
            grid_spec=pl.GridSpec(
                grid=(num_tiles,),
                in_specs=[feat_spec, feat_spec],
                out_specs=out_spec,
            ),
            compiler_params=compiler_params,
        )(feat_p, centers_batch)

    # Tiny final reduction + ( .sum() / 2.0 / batch_size )
    return jnp.sum(partial) / 2.0 / jnp.asarray(batch_size, jnp.float32)


def _reference(feature, label, centers, batch_size):
    return jnp.sum((feature - centers[label]) ** 2) / 2.0 / batch_size


if __name__ == "__main__":
    key = jax.random.PRNGKey(0)
    k_feat, k_lbl, k_cent, k2 = jax.random.split(key, 4)

    # --- test 1: small module-like shapes (fused gather, single tile, D=32) ---
    B, C, D = 8, 10, 32
    feature = jax.random.normal(k_feat, (B, D), dtype=jnp.float32)
    label = jax.random.randint(k_lbl, (B,), 0, C, dtype=jnp.int32)
    centers = jax.random.normal(k_cent, (C, D), dtype=jnp.float32)

    loss = jax.block_until_ready(center_loss(feature, label, centers, float(B)))
    ref = _reference(feature, label, centers, float(B))
    assert jnp.allclose(loss, ref, rtol=1e-5, atol=1e-5), (loss, ref)

    # --- test 2: fused path, multiple tiles, row padding, 128-aligned D ------
    B2, C2, D2 = 36, 16, 128
    k_f2, k_l2, k_c2, k3 = jax.random.split(k2, 4)
    feature2 = jax.random.normal(k_f2, (B2, D2), dtype=jnp.float32)
    label2 = jax.random.randint(k_l2, (B2,), 0, C2, dtype=jnp.int32)
    centers2 = jax.random.normal(k_c2, (C2, D2), dtype=jnp.float32)

    loss2 = jax.block_until_ready(
        center_loss(feature2, label2, centers2, float(B2),
                    target_block_bytes=8 * D2 * 4))   # force tile_b=8 -> 5 tiles
    ref2 = _reference(feature2, label2, centers2, float(B2))
    assert jnp.allclose(loss2, ref2, rtol=1e-5, atol=1e-5), (loss2, ref2)

    # --- test 3: fallback path (hoisted XLA gather + streaming kernel) -------
    loss3 = jax.block_until_ready(
        center_loss(feature2, label2, centers2, float(B2),
                    fuse_gather_limit_bytes=0))
    assert jnp.allclose(loss3, ref2, rtol=1e-5, atol=1e-5), (loss3, ref2)

    print("KERNEL_OK")
</pallas_src>

<mosaic_0001>
module attributes {stable_mosaic.version = 11 : i64} {
  func.func @_fused_center_loss_kernel(%arg0: i32, %arg1: memref<8x32xf32, #tpu.memory_space<vmem>>, %arg2: memref<8x1xi32, #tpu.memory_space<vmem>>, %arg3: memref<10x32xf32, #tpu.memory_space<vmem>>, %arg4: memref<8x1xf32, #tpu.memory_space<vmem>>) attributes {dimension_semantics = [#tpu.dimension_semantics<parallel>], iteration_bounds = array<i64: 1>, scalar_prefetch = 0 : i64, scratch_operands = 0 : i64, tpu.core_type = #tpu.core_type<tc>, window_params = [{transform_indices = @transform_0, window_bounds = array<i64: 8, 32>}, {transform_indices = @transform_1, window_bounds = array<i64: 8, 1>}, {pipeline_mode = #tpu.pipeline_mode<synchronous>, transform_indices = @transform_2, window_bounds = array<i64: 10, 32>}, {transform_indices = @transform_3, window_bounds = array<i64: 8, 1>}]} {
    %c0 = arith.constant 0 : index
    %c0_0 = arith.constant 0 : index
    %0 = vector.load %arg1[%c0, %c0_0] : memref<8x32xf32, #tpu.memory_space<vmem>>, vector<8x32xf32>
    %c0_1 = arith.constant 0 : index
    %c0_2 = arith.constant 0 : index
    %1 = vector.load %arg3[%c0_1, %c0_2] : memref<10x32xf32, #tpu.memory_space<vmem>>, vector<10x32xf32>
    %c0_3 = arith.constant 0 : index
    %c0_4 = arith.constant 0 : index
    %2 = vector.load %arg2[%c0_3, %c0_4] : memref<8x1xi32, #tpu.memory_space<vmem>>, vector<8x1xi32>
    %3 = tpu.iota {dimensions = array<i32: 1>} : vector<8x10xi32>
    %4 = vector.broadcast %2 : vector<8x1xi32> to vector<8x10xi32>
    %5 = arith.cmpi eq, %4, %3 : vector<8x10xi32>
    %cst = arith.constant 1.000000e+00 : f32
    %cst_5 = arith.constant 0.000000e+00 : f32
    %6 = vector.broadcast %cst : f32 to vector<8x10xf32>
    %7 = vector.broadcast %cst_5 : f32 to vector<8x10xf32>
    %8 = arith.select %5, %6, %7 : vector<8x10xi1>, vector<8x10xf32>
    %cst_6 = arith.constant dense<0.000000e+00> : vector<8x32xf32>
    %9 = tpu.matmul %8, %1, %cst_6 {dimension_numbers = #tpu.dot_dimension_numbers<[1], [0], [0], [1], [0, 0, 1, 1], [], []>} : vector<8x10xf32>, vector<10x32xf32>, vector<8x32xf32> -> vector<8x32xf32>
    %10 = arith.subf %0, %9 : vector<8x32xf32>
    %11 = arith.mulf %10, %10 : vector<8x32xf32>
    %cst_7 = arith.constant dense<0.000000e+00> : vector<8xf32>
    %12 = vector.multi_reduction <add>, %11, %cst_7 [1] : vector<8x32xf32> to vector<8xf32>
    %13 = vector.shape_cast %12 : vector<8xf32> to vector<8x1xf32>
    %14 = vector.shape_cast %13 : vector<8x1xf32> to vector<1x8x1xf32>
    %cst_8 = arith.constant dense<0.000000e+00> : vector<8x1xf32>
    %15 = vector.multi_reduction <add>, %14, %cst_8 [0] : vector<1x8x1xf32> to vector<8x1xf32>
    %c0_9 = arith.constant 0 : index
    %c0_10 = arith.constant 0 : index
    %16 = vector.load %arg4[%c0_9, %c0_10] : memref<8x1xf32, #tpu.memory_space<vmem>>, vector<8x1xf32>
    tpu.vector_store %arg4[%c0_9, %c0_10], %15 {strides = array<i32>} : memref<8x1xf32, #tpu.memory_space<vmem>>, vector<8x1xf32>,
    return
  }
  func.func @transform_0(%arg0: i32) -> (i32, i32) {
    %c0_i32 = arith.constant 0 : i32
    %c0_i32_0 = arith.constant 0 : i32
    return %arg0, %c0_i32 : i32, i32
  }
  func.func @transform_1(%arg0: i32) -> (i32, i32) {
    %c0_i32 = arith.constant 0 : i32
    %c0_i32_0 = arith.constant 0 : i32
    return %arg0, %c0_i32 : i32, i32
  }
  func.func @transform_2(%arg0: i32) -> (i32, i32) {
    %c0_i32 = arith.constant 0 : i32
    %c0_i32_0 = arith.constant 0 : i32
    %c0_i32_1 = arith.constant 0 : i32
    return %c0_i32, %c0_i32_0 : i32, i32
  }
  func.func @transform_3(%arg0: i32) -> (i32, i32) {
    %c0_i32 = arith.constant 0 : i32
    %c0_i32_0 = arith.constant 0 : i32
    return %arg0, %c0_i32 : i32, i32
  }
}

</mosaic_0001>

<bundles_post_ra>
// kernel: center_loss.1
= control target key start
LH: loop header
LB: loop body
LE: loop exit
PB: predicated region body
PF: predicated region fallthrough
CT: control target
= control target key end

     0   :  { %8 = vsyncpa [#allocation3], 0  ;;  %s176_s12 = smov [#allocation2]   ;;  %s226_s0 = inlined_call_operand.hbm [shape: f32[8,32], index: 0, kind: input, shape index: {}]   ;;  %s227_s1 = inlined_call_operand.vmem [shape: s32[8,1], index: 1, kind: input, shape index: {}]   ;;  %s228_s2 = inlined_call_operand.vmem [shape: f32[10,32], index: 2, kind: input, shape index: {}]   ;;  %s229_s3 = inlined_call_operand.vmem [shape: f32[8,1], index: 3, kind: output, shape index: {}]  }
   0x1   :  { %s15_s13 = sshll.u32 %s176_s12, 4  ;;  %s152_s16 = scalar_lea.hbm %s226_s0, 128  ;;  %s16_s13 = int_to_ptr.vmem [resolvable:$true] %s15_s13 }
   0x2   :  { %p153_p0 = scmp.ne.s32.totalorder %s226_s0, %s152_s16  ;;  %p156_p1 = scmp.lt.u32.totalorder %s152_s16, %s226_s0 }
   0x4   :  { %p158_p2 = pnand %p156_p1, %p153_p0 }
   0x6   :  { %161 = shalt.err (!%p158_p2)
}
   0x7   :  { %s162_s21 = scalar_lea.vmem %s16_s13, 128  ;;  %p167_p4 = scmp.lt.s32.totalorder %s16_s13, %s16_s13 }
   0x8   :  { %p163_p3 = scmp.ne.s32.totalorder %s16_s13, %s162_s21  ;;  %p168_p5 = scmp.lt.s32.totalorder %s162_s21, %s162_s21 }
   0xa   :  { %p169_p6 = por %p168_p5, %p167_p4 }
   0xc   :  { %p170_p7 = pnand %p169_p6, %p163_p3 }
   0xe   :  { %173 = shalt.err (!%p170_p7)
}
   0xf   :  { %18 = dma.hbm_to_vmem [thread:$0]  %s226_s0, 128, %s16_s13, [#allocation3]  }
  0x10   :  { %174 = dma.done.wait [#allocation3], 128  }
  0x11   :  { %175 = vsyncadd [#allocation3], 4294967168  ;;  %v177_v0 = vmov 0   ;;  %v178_v1 = vmov 0.0|0.0   ;;  %vm41_vm0 = vcmask 1041408   ;;  %vm179_vm1 = vmmov 1  }
  0x12   :  { %151 = vset.pattern.permute.xlu0 %v177_v0  ;;  %141 = vmatprep.subr.bf16.mxu0 %v178_v1  ;;  %vm143_vm2 = vmpackc.low %vm41_vm0, %vm179_vm1  ;;  %v29_v2 = vld [vmem:[%s227_s1] sm:$0xff]  ;;  %v28_v4 = vld [vmem:[%s228_s2 + $0x8] sm:$0x3]  ;;  %vm180_vm3 = vmmov 0   ;;  %v181_v6 = vmov 0.0   ;;  %v30_v7 = vlaneseq  ;;  %vm37_vm4 = vcmask 80896  }
  0x13   :  { %v27_v3 = vld [vmem:[%s228_s2] sm:$0xff]  ;;  %33 = vperm.xlu0 %151, %v29_v2   ;;  %138 = vmatprep.mubr.msk.f32.mxu0 %vm180_vm3, %v181_v6  ;;  %vm117_vm6 = vcmask 261120   ;;  %vm122_vm7 = vcmask 7168  }
  0x14   :  { %v142_v5 = vpack.c.bf16 %v28_v4, %v27_v3  ;;  %v31_v8 = vand.u32 127, %v30_v7  ;;  %v26_v11 = vld [vmem:[#allocation2] sm:$0xff] }
  0x16   :  { %144 = vmatpush3.bf16.msk.msra.mxu0 %vm143_vm2, %v142_v5 }
  0x92   :  { %v34_v9 = vpop.permute.xlu0 %33 }
  0x93   :  { %vm35_vm5 = vcmp.eq.s32.totalorder %v34_v9, %v31_v8 }
  0x94   :  { %v36_v10 = vsel %vm35_vm5, 1.0, %v181_v6 }
  0x95   :  { %139 = vmatmul.mubr.msk.f32.vlgmr.msra.gmra.mrb[0].mxu0 %vm37_vm4, %v36_v10 }
 0x168   :  { %v111_v12 = vpop.f32.mrb[0].mxu0 }
 0x169   :  { %v115_v13 = vsub.f32 %v26_v11, %v111_v12  ;;  %v140_v14 = vpop.f32.mrb[1].mxu0 }
 0x16b   :  { %v116_v15 = vmul.f32 %v115_v13, %v115_v13 }
 0x16d   :  { %v118_v16 = vsel %vm117_vm6, %v116_v15, 0.0 }
 0x16e   :  { %119 = vadd.xlane.f32.xlu0 %v118_v16 }
 0x1fb   :  { %v120_v17 = vpop.xlane.xlu0 %119 }
 0x1fc   :  { %123 = vst.msk [vmem:[%s229_s3] sm:$0xff] %vm122_vm7, %v120_v17 }
 0x1fd   :  { %128 = vsyncpa [#allocation3], 1 }

</bundles_post_ra>
